<compile_context>
chip_gen: v6e
topology: v6e:2x2x1
jax: 0.10.0
libtpu: 0.0.40
codegen_flags: <defaults>
</compile_context>

<pallas_src>
import jax
import jax.numpy as jnp
from jax import lax
from jax.experimental import pallas as pl
from jax.experimental.pallas import tpu as pltpu


def _round_up(x, m):
    return (x + m - 1) // m * m


# ----------------------------------------------------------------------------
# Pallas kernel: K accumulated matmuls on a halo'd lane tile + fused offset
# ----------------------------------------------------------------------------
def _msn_conv1d_kernel(xm_ref, xh_ref, w_ref, off_ref, o_ref):
    # xm_ref:  (C_in, TILE_L)    VMEM  main input lane tile (NCL layout)
    # xh_ref:  (C_in, 128)       VMEM  halo block right after the main tile
    # w_ref:   (K, C_out, C_in)  VMEM  spectrally-normalized weight, k-major
    # off_ref: (C_out, 1)        VMEM  precomputed (mean_bias - analytic mean)
    # o_ref:   (C_out, TILE_L)   VMEM  lane-dense NCL output tile
    K = w_ref.shape[0]
    c_out, tile_l = o_ref.shape

    # (C_in, TILE_L + 128): tile plus halo, all static slicing from here on.
    xw = jnp.concatenate([xm_ref[...], xh_ref[...]], axis=1)

    acc = jnp.zeros((c_out, tile_l), jnp.float32)
    for k in range(K):  # K is small and static -> fully unrolled
        acc = acc + jnp.dot(w_ref[k], xw[:, k:k + tile_l],
                            preferred_element_type=jnp.float32)

    # Mean subtraction + module bias, folded into one broadcasted f32 add.
    o_ref[...] = (acc + off_ref[...]).astype(o_ref.dtype)


def msn_conv1d(x, weight_sn, conv_bias, mean_bias, *, tile_l_cap=8192,
               compute_dtype=None):
    """x: (N, C_in, L) NCL.  Returns (N, C_out, L_out) NCL, training-mode output."""
    del conv_bias  # algebraically cancelled by the training-mode mean subtraction
    N, C_in, L = x.shape
    C_out, _, K = weight_sn.shape
    L_out = L - K + 1
    NL = N * L_out
    if K - 1 > 128:
        raise NotImplementedError("halo block assumes kernel_size - 1 <= 128")

    # ---- balanced lane tiling of L_out (tiles are multiples of 128) --------
    num_l = pl.cdiv(L_out, tile_l_cap)
    TILE_L = _round_up(pl.cdiv(L_out, num_l), 128)
    num_l = pl.cdiv(L_out, TILE_L)
    L_out_pad = num_l * TILE_L
    L_pad = L_out_pad + 128          # room for the last tile's halo block

    # ---- hoisted analytic mean / bias offset (tiny, f32, one pass over x) --
    # col_sum[ci,k] = sum_{n,l} x[n,ci,l+k]; mu = (W . col_sum) / (N*L_out)
    xs = jnp.sum(x.astype(jnp.float32), axis=0)                        # (C_in, L)
    col_sum = jnp.stack([jnp.sum(xs[:, k:k + L_out], axis=1)
                         for k in range(K)], axis=1)                   # (C_in, K)
    mu = jnp.einsum("ock,ck->o", weight_sn.astype(jnp.float32),
                    col_sum) / float(NL)
    offset = mean_bias.astype(jnp.float32).reshape(C_out, 1) - mu[:, None]

    # ---- operand layout: single cheap zero-pad, NO K-expanded im2col -------
    x_p = jnp.pad(x, ((0, 0), (0, 0), (0, L_pad - L)))
    w_k = jnp.transpose(weight_sn, (2, 0, 1))                          # (K,C_out,C_in)
    if compute_dtype is not None:        # optional bf16 streaming (v6e/v7x/v5e)
        x_p = x_p.astype(compute_dtype)
        w_k = w_k.astype(compute_dtype)
    in_item = x_p.dtype.itemsize

    # ---- VMEM limit derived from the real block working set ----------------
    x_blk = _round_up(C_in, 8) * TILE_L * in_item
    h_blk = _round_up(C_in, 8) * 128 * in_item
    o_blk = _round_up(C_out, 8) * TILE_L * 4
    w_blk = K * _round_up(C_out, 8) * _round_up(C_in, 128) * in_item
    off_blk = _round_up(C_out, 8) * 128 * 4
    working = 2 * (x_blk + h_blk + o_blk) + w_blk + off_blk            # dbl-buffered I/O
    vmem_limit = int(min(max(2 * working + (4 << 20), 8 << 20), 64 << 20))

    flops = 2 * N * num_l * C_out * C_in * K * TILE_L
    bytes_accessed = int((x_p.size + N * C_in * 128 * num_l + w_k.size) * in_item
                         + 4 * (offset.size + N * C_out * L_out_pad))

    halo_step = TILE_L // 128

    out = pl.pallas_call(
        _msn_conv1d_kernel,
        out_shape=jax.ShapeDtypeStruct((N, C_out, L_out_pad), jnp.float32),
        grid=(N, num_l),
        in_specs=[
            # main lane tile of x (block index depends on both grid axes)
            pl.BlockSpec((None, C_in, TILE_L), lambda n, lt: (n, 0, lt)),
            # 128-lane halo block immediately after the main tile
            pl.BlockSpec((None, C_in, 128),
                         lambda n, lt: (n, 0, (lt + 1) * halo_step)),
            # tiny resident operands (fetched once)
            pl.BlockSpec((K, C_out, C_in), lambda n, lt: (0, 0, 0)),
            pl.BlockSpec((C_out, 1), lambda n, lt: (0, 0)),
        ],
        out_specs=pl.BlockSpec((None, C_out, TILE_L), lambda n, lt: (n, 0, lt)),
        compiler_params=pltpu.CompilerParams(
            dimension_semantics=("parallel", "parallel"),
            vmem_limit_bytes=vmem_limit,
        ),
        cost_estimate=pl.CostEstimate(
            flops=flops, transcendentals=0, bytes_accessed=bytes_accessed),
    )(x_p, x_p, w_k, offset)

    # Ragged tail: cheap lane slice (no transpose); no-op when L_out is tiled exactly.
    if L_out_pad != L_out:
        out = out[:, :, :L_out]
    return out


# ----------------------------------------------------------------------------
# Spectral norm via power iteration (deterministic parameter setup, plain JAX)
# ----------------------------------------------------------------------------
def spectral_normalize(weight, u0, num_iter=100, eps=1e-12):
    """weight: (C_out, C_in, K). Returns weight / sigma."""
    C_out = weight.shape[0]
    w_mat = weight.reshape(C_out, -1)                        # (C_out, C_in*K)

    def l2norm(v):
        return v / (jnp.linalg.norm(v) + eps)

    def body(_, u):
        v = l2norm(u @ w_mat)                                # (1, C_in*K)
        u = l2norm(v @ w_mat.T)                              # (1, C_out)
        return u

    u = lax.fori_loop(0, num_iter, body, u0)
    v = l2norm(u @ w_mat)
    sigma = jnp.sum((u @ w_mat) * v)
    return weight / sigma


# ----------------------------------------------------------------------------
# Pure-JAX reference (training-mode forward, including the conv bias that the
# kernel omits — proves the algebraic cancellation).
# ----------------------------------------------------------------------------
def _reference(x, weight_sn, conv_bias, mean_bias):
    N, C_in, L = x.shape
    C_out, _, K = weight_sn.shape
    L_out = L - K + 1
    ref = jnp.zeros((N, C_out, L_out), jnp.float32)
    for k in range(K):
        ref = ref + jnp.einsum("oc,ncl->nol", weight_sn[:, :, k],
                               x[:, :, k:k + L_out])
    ref = ref + conv_bias[None, :, :]
    mu = jnp.mean(ref, axis=(0, 2), keepdims=True)
    return ref - mu + mean_bias[None, :, :]


# ----------------------------------------------------------------------------
# Demo
# ----------------------------------------------------------------------------
if __name__ == "__main__":
    key = jax.random.PRNGKey(0)
    k_x, k_w, k_b, k_u, k_x2 = jax.random.split(key, 5)

    # Small shapes consistent with the module's forward (3-D NCL input).
    N, C_in, C_out, K, L = 2, 4, 8, 3, 16
    L_out = L - K + 1

    x = jax.random.normal(k_x, (N, C_in, L), dtype=jnp.float32)

    # Deterministic parameter init (Conv1d weight/bias, power-iteration u,
    # and the module's extra `bias` parameter which is zero-initialized).
    weight = jax.random.normal(k_w, (C_out, C_in, K), dtype=jnp.float32) * 0.1
    conv_bias = jax.random.normal(k_b, (C_out, 1), dtype=jnp.float32) * 0.1
    mean_bias = jnp.zeros((C_out, 1), dtype=jnp.float32)     # self.bias
    u0 = jax.random.normal(k_u, (1, C_out), dtype=jnp.float32)

    weight_sn = spectral_normalize(weight, u0, num_iter=100)

    out = jax.block_until_ready(msn_conv1d(x, weight_sn, conv_bias, mean_bias))
    assert out.shape == (N, C_out, L_out)
    ref = _reference(x, weight_sn, conv_bias, mean_bias)
    assert jnp.allclose(out, ref, atol=1e-4, rtol=1e-4), "mismatch vs reference"

    # Longer sequence: exercises lane padding + ragged output tail.
    L2 = 600
    x2 = jax.random.normal(k_x2, (N, C_in, L2), dtype=jnp.float32)
    ref2 = _reference(x2, weight_sn, conv_bias, mean_bias)
    out2 = jax.block_until_ready(msn_conv1d(x2, weight_sn, conv_bias, mean_bias))
    assert out2.shape == (N, C_out, L2 - K + 1)
    assert jnp.allclose(out2, ref2, atol=1e-4, rtol=1e-4), "mismatch (single tile)"

    # Force multiple lane tiles so the cross-tile halo path is exercised.
    out3 = jax.block_until_ready(
        msn_conv1d(x2, weight_sn, conv_bias, mean_bias, tile_l_cap=256))
    assert out3.shape == (N, C_out, L2 - K + 1)
    assert jnp.allclose(out3, ref2, atol=1e-4, rtol=1e-4), "mismatch (multi-tile halo)"

    print("KERNEL_OK")
</pallas_src>

<mosaic_0001>
module attributes {stable_mosaic.version = 11 : i64} {
  func.func @_msn_conv1d_kernel(%arg0: i32, %arg1: i32, %arg2: memref<1x4x128xf32, #tpu.memory_space<vmem>>, %arg3: memref<1x4x128xf32, #tpu.memory_space<vmem>>, %arg4: memref<3x8x4xf32, #tpu.memory_space<vmem>>, %arg5: memref<8x1xf32, #tpu.memory_space<vmem>>, %arg6: memref<1x8x128xf32, #tpu.memory_space<vmem>>) attributes {dimension_semantics = [#tpu.dimension_semantics<parallel>, #tpu.dimension_semantics<parallel>], iteration_bounds = array<i64: 2, 1>, scalar_prefetch = 0 : i64, scratch_operands = 0 : i64, tpu.core_type = #tpu.core_type<tc>, window_params = [{transform_indices = @transform_0, window_bounds = array<i64: 1, 4, 128>}, {transform_indices = @transform_1, window_bounds = array<i64: 1, 4, 128>}, {pipeline_mode = #tpu.pipeline_mode<synchronous>, transform_indices = @transform_2, window_bounds = array<i64: 3, 8, 4>}, {pipeline_mode = #tpu.pipeline_mode<synchronous>, transform_indices = @transform_3, window_bounds = array<i64: 8, 1>}, {transform_indices = @transform_4, window_bounds = array<i64: 1, 8, 128>}]} {
    %c0 = arith.constant 0 : index
    %c0_0 = arith.constant 0 : index
    %c0_1 = arith.constant 0 : index
    %0 = vector.load %arg2[%c0, %c0_0, %c0_1] : memref<1x4x128xf32, #tpu.memory_space<vmem>>, vector<1x4x128xf32>
    %1 = vector.shape_cast %0 : vector<1x4x128xf32> to vector<4x128xf32>
    %c0_2 = arith.constant 0 : index
    %c0_3 = arith.constant 0 : index
    %c0_4 = arith.constant 0 : index
    %2 = vector.load %arg3[%c0_2, %c0_3, %c0_4] : memref<1x4x128xf32, #tpu.memory_space<vmem>>, vector<1x4x128xf32>
    %3 = vector.shape_cast %2 : vector<1x4x128xf32> to vector<4x128xf32>
    %4 = tpu.concatenate %1, %3 in 1 : vector<4x128xf32>, vector<4x128xf32> -> vector<4x256xf32>
    %cst = arith.constant 0.000000e+00 : f32
    %5 = vector.broadcast %cst : f32 to vector<8x128xf32>
    %c0_5 = arith.constant 0 : index
    %c0_6 = arith.constant 0 : index
    %c0_7 = arith.constant 0 : index
    %6 = vector.load %arg4[%c0_5, %c0_6, %c0_7] : memref<3x8x4xf32, #tpu.memory_space<vmem>>, vector<1x8x4xf32>
    %7 = vector.shape_cast %6 : vector<1x8x4xf32> to vector<8x4xf32>
    %8 = vector.extract_strided_slice %4 {offsets = [0, 0], sizes = [4, 128], strides = [1, 1]} : vector<4x256xf32> to vector<4x128xf32>
    %cst_8 = arith.constant dense<0.000000e+00> : vector<8x128xf32>
    %9 = tpu.matmul %7, %8, %cst_8 {dimension_numbers = #tpu.dot_dimension_numbers<[1], [0], [0], [1], [0, 0, 1, 1], [], []>} : vector<8x4xf32>, vector<4x128xf32>, vector<8x128xf32> -> vector<8x128xf32>
    %10 = arith.addf %5, %9 : vector<8x128xf32>
    %c1 = arith.constant 1 : index
    %c0_9 = arith.constant 0 : index
    %c0_10 = arith.constant 0 : index
    %11 = vector.load %arg4[%c1, %c0_9, %c0_10] : memref<3x8x4xf32, #tpu.memory_space<vmem>>, vector<1x8x4xf32>
    %12 = vector.shape_cast %11 : vector<1x8x4xf32> to vector<8x4xf32>
    %13 = vector.extract_strided_slice %4 {offsets = [0, 1], sizes = [4, 128], strides = [1, 1]} : vector<4x256xf32> to vector<4x128xf32>
    %cst_11 = arith.constant dense<0.000000e+00> : vector<8x128xf32>
    %14 = tpu.matmul %12, %13, %cst_11 {dimension_numbers = #tpu.dot_dimension_numbers<[1], [0], [0], [1], [0, 0, 1, 1], [], []>} : vector<8x4xf32>, vector<4x128xf32>, vector<8x128xf32> -> vector<8x128xf32>
    %15 = arith.addf %10, %14 : vector<8x128xf32>
    %c2 = arith.constant 2 : index
    %c0_12 = arith.constant 0 : index
    %c0_13 = arith.constant 0 : index
    %16 = vector.load %arg4[%c2, %c0_12, %c0_13] : memref<3x8x4xf32, #tpu.memory_space<vmem>>, vector<1x8x4xf32>
    %17 = vector.shape_cast %16 : vector<1x8x4xf32> to vector<8x4xf32>
    %18 = vector.extract_strided_slice %4 {offsets = [0, 2], sizes = [4, 128], strides = [1, 1]} : vector<4x256xf32> to vector<4x128xf32>
    %cst_14 = arith.constant dense<0.000000e+00> : vector<8x128xf32>
    %19 = tpu.matmul %17, %18, %cst_14 {dimension_numbers = #tpu.dot_dimension_numbers<[1], [0], [0], [1], [0, 0, 1, 1], [], []>} : vector<8x4xf32>, vector<4x128xf32>, vector<8x128xf32> -> vector<8x128xf32>
    %20 = arith.addf %15, %19 : vector<8x128xf32>
    %c0_15 = arith.constant 0 : index
    %c0_16 = arith.constant 0 : index
    %21 = vector.load %arg5[%c0_15, %c0_16] : memref<8x1xf32, #tpu.memory_space<vmem>>, vector<8x1xf32>
    %22 = vector.broadcast %21 : vector<8x1xf32> to vector<8x128xf32>
    %23 = arith.addf %20, %22 : vector<8x128xf32>
    %c0_17 = arith.constant 0 : index
    %c0_18 = arith.constant 0 : index
    %c0_19 = arith.constant 0 : index
    %24 = vector.load %arg6[%c0_17, %c0_18, %c0_19] : memref<1x8x128xf32, #tpu.memory_space<vmem>>, vector<1x8x128xf32>
    %25 = vector.shape_cast %24 : vector<1x8x128xf32> to vector<8x128xf32>
    %26 = vector.shape_cast %23 : vector<8x128xf32> to vector<1x8x128xf32>
    tpu.vector_store %arg6[%c0_17, %c0_18, %c0_19], %26 {strides = array<i32>} : memref<1x8x128xf32, #tpu.memory_space<vmem>>, vector<1x8x128xf32>,
    return
  }
  func.func @transform_0(%arg0: i32, %arg1: i32) -> (i32, i32, i32) {
    %c0_i32 = arith.constant 0 : i32
    %c0_i32_0 = arith.constant 0 : i32
    return %arg0, %c0_i32, %arg1 : i32, i32, i32
  }
  func.func @transform_1(%arg0: i32, %arg1: i32) -> (i32, i32, i32) {
    %c1_i32 = arith.constant 1 : i32
    %0 = arith.addi %arg1, %c1_i32 : i32
    %c1_i32_0 = arith.constant 1 : i32
    %1 = arith.muli %0, %c1_i32_0 : i32
    %c0_i32 = arith.constant 0 : i32
    %c0_i32_1 = arith.constant 0 : i32
    return %arg0, %c0_i32, %1 : i32, i32, i32
  }
  func.func @transform_2(%arg0: i32, %arg1: i32) -> (i32, i32, i32) {
    %c0_i32 = arith.constant 0 : i32
    %c0_i32_0 = arith.constant 0 : i32
    %c0_i32_1 = arith.constant 0 : i32
    %c0_i32_2 = arith.constant 0 : i32
    return %c0_i32, %c0_i32_0, %c0_i32_1 : i32, i32, i32
  }
  func.func @transform_3(%arg0: i32, %arg1: i32) -> (i32, i32) {
    %c0_i32 = arith.constant 0 : i32
    %c0_i32_0 = arith.constant 0 : i32
    %c0_i32_1 = arith.constant 0 : i32
    return %c0_i32, %c0_i32_0 : i32, i32
  }
  func.func @transform_4(%arg0: i32, %arg1: i32) -> (i32, i32, i32) {
    %c0_i32 = arith.constant 0 : i32
    %c0_i32_0 = arith.constant 0 : i32
    return %arg0, %c0_i32, %arg1 : i32, i32, i32
  }
}

</mosaic_0001>

<bundles_post_ra>
// kernel: tpu_custom_call.1
= control target key start
LH: loop header
LB: loop body
LE: loop exit
PB: predicated region body
PF: predicated region fallthrough
CT: control target
= control target key end

     0   :  { %9 = vsyncpa [#allocation3], 0  ;;  %s963_s0 = inlined_call_operand.vmem [shape: f32[2,4,256], index: 0, kind: input, shape index: {}]   ;;  %s964_s1 = inlined_call_operand.vmem [shape: f32[2,4,256], index: 1, kind: input, shape index: {}]   ;;  %s965_s2 = inlined_call_operand.vmem [shape: f32[3,8,4], index: 2, kind: input, shape index: {}]   ;;  %s966_s3 = inlined_call_operand.vmem [shape: f32[8,1], index: 3, kind: input, shape index: {}]   ;;  %s967_s4 = inlined_call_operand.hbm [shape: f32[2,8,128], index: 4, kind: output, shape index: {}]  }
   0x1   :  { %11 = vsyncpa [#allocation3 + $0x1], 0  ;;  %s840_s15 = smov 0   ;;  %s842_s16 = smov 0  }
   0x2   :  { %s844_s17 = smov 0   ;;  %s846_s18 = smov 0  }
   0x3   :  { %s848_s19 = smov 0   ;;  %s850_s20 = smov 0  }
   0x4 LB: > { %s623_s21 = sadd.s32 4294967295, %s807_s20   ;;  %s624_s22 = sadd.s32 4294967294, %s807_s20   ;;  %s807_s20 = sphi %s850_s20, %s17_s20   ;;  %s803_s19 = sphi %s848_s19, %s974_s19   ;;  %s799_s18 = sphi %s846_s18, %s973_s18   ;;  %s795_s17 = sphi %s844_s17, %s972_s17   ;;  %s791_s16 = sphi %s842_s16, %s971_s16   ;;  %s787_s15 = sphi %s840_s15, %s970_s15  }
   0x5   : > { %s29_s23 = sadd.s32 1, %s803_s19  ;;  %s138_s24 = sadd.s32 1, %s795_s17 }
   0x6   : > { %p31_p0 = scmp.ge.s32.totalorder %s29_s23, 2  ;;  %p148_p1 = scmp.ne.s32.totalorder %s795_s17, %s791_s16 }
   0x7   : > { %p149_p2 = scmp.eq.s32.totalorder %s623_s21, 1  ;;  %p154_p3 = scmp.ne.s32.totalorder %s791_s16, %s787_s15 }
   0x8   : > { %s976_s23 = smov (%p31_p0, %s29_s23), 0  ;;  %p155_p5 = scmp.eq.s32.totalorder %s624_s22, 1 }
   0x9   : > { %p880_p4 = por %p149_p2, %p148_p1  ;;  %s133_s26 = ssub.s32 %s803_s19, %s976_s23 }
   0xa   : > { %p627_p6 = scmp.ge.s32.totalorder %s807_s20, 1  ;;  %p136_p7 = scmp.eq.s32.totalorder %s133_s26, 0 }
   0xb   : > { %p887_p8 = por %p155_p5, %p154_p3  ;;  %p203_p9 = scmp.lt.s32.totalorder %s807_s20, 3 }
   0xc   : > { %s893_s28 = scalar_select %p136_p7, %s795_s17, %s138_s24  }
   0xd   : > { %p204_p10 = pnand %p627_p6, %p203_p9 }
   0xe   : > { %p241_p11 = scmp.lt.s32.totalorder (!%p204_p10), %s799_s18, 1  ;;  %s812_s14 = smov (!%p204_p10), 126  }
   0xf   : > { %207 = sbr.rel (%p204_p10) target bundleno = 360 (0x168), region = 36  ;;  %s813_s21 = smov (!%p204_p10), 127  }
  0x10   : > { %s238_s6 = sand.u32 (!%p204_p10), 1, %s791_s16   ;;  %s814_s22 = smov (!%p204_p10), [#allocation2]  }
  0x11   : > { %s735_s24 = sshll.u32 (!%p204_p10), %s814_s22, 4  ;;  %s736_s24 = int_to_ptr.vmem [resolvable:$false] %s735_s24 }
  0x14   : > { %v809_v0 = vmov 0.0   ;;  %s242_s29 = scalar_select %p241_p11, %s799_s18, 1  ;;  %vm810_vm0 = vmmov 0   ;;  %vm276_vm1 = vcmask 1043456   ;;  %v811_v1 = vmov 0   ;;  %v261_v3 = vld [vmem:[%s965_s2] sm:$0xff] }
  0x15   : > { %655 = vmatprep.subr.mxu0 %v809_v0  ;;  %660 = vmatprep.subr.mxu1 %v809_v0  ;;  %vm272_vm2 = vcmask 31744   ;;  %v508_v5 = vld [vmem:[%s966_s3] sm:$0xff]  ;;  %vm270_vm3 = vcmask 1039360   ;;  %vm430_vm4 = vcmask 1031168   ;;  %v633_v10 = vld [vmem:[%s965_s2 + $0x8] sm:$0xff]  ;;  %v638_v13 = vld [vmem:[%s965_s2 + $0x10] sm:$0xff] }
  0x16   : > { %657 = vmatprep.mubr.msk.f32.mxu0 %vm810_vm0, %v809_v0  ;;  %662 = vmatprep.mubr.msk.f32.mxu1 %vm810_vm0, %v809_v0  ;;  %s645_s30 = sshll.u32 %s242_s29, 3 }
  0x17   : > { %s248_s7 = scalar_lea.vmem %s963_s0, %s645_s30  ;;  %s647_s8 = sadd.s32 4, %s645_s30  ;;  %730 = vset.pattern.permute.xlu0 %v811_v1 }
  0x18   : > { %v259_v2 = vld [vmem:[%s248_s7] sm:$0xf]  ;;  %s257_s11 = scalar_lea.vmem %s964_s1, %s647_s8  ;;  %s628_s7 = sshll.u32 %s238_s6, 3 }
  0x19   : > { %426 = vrot.lane.b32.xlu1 %v259_v2, %s812_s14  ;;  %266 = vrot.lane.b32.xlu0 %v259_v2, %s813_s21  ;;  %v260_v4 = vld [vmem:[%s257_s11] sm:$0xf]  ;;  %s642_s8 = sshll.u32 %s799_s18, 7  ;;  %s240_s9 = scalar_lea.vmem [#allocation2], %s628_s7 }
  0x1a   : > { %661 = vmatpush3.msk.msra.mxu1 %vm276_vm1, %v259_v2  ;;  %s531_s10 = sshll.u32 %s240_s9, 4  ;;  %s529_s13 = scalar_lea.hbm %s967_s4, %s642_s8  ;;  %s532_s10 = int_to_ptr.vmem [resolvable:$true] %s531_s10 }
  0x1b   : > { %663 = vmatmul.mubr.msk.f32.vlgmr.msra.gmra.mxu1 %vm272_vm2, %v261_v3  ;;  %s737_s18 = scalar_lea.vmem %s736_s24, 256  ;;  %p738_p1 = scmp.lt.s32.totalorder %s532_s10, %s736_s24 }
  0x1d   : > { %428 = vrot.lane.b32.xlu1 %v260_v4, %s812_s14  ;;  %268 = vrot.lane.b32.xlu0 %v260_v4, %s813_s21  ;;  %s517_s14 = scalar_lea.sflag [#allocation3], %s238_s6  ;;  %s731_s21 = scalar_lea.vmem %s532_s10, 128 }
  0x1e   : > { %p732_p12 = scmp.ne.s32.totalorder %s532_s10, %s731_s21  ;;  %p739_p2 = scmp.lt.s32.totalorder %s737_s18, %s731_s21 }
  0x20   : > { %p733_p13 = pnand %p732_p12, %p880_p4  ;;  %p740_p3 = por %p739_p2, %p738_p1 }
  0x21   : > { %511 = vperm.xlu0 %730, %v508_v5  }
  0x22   : > { %p734_p0 = pneg %p733_p13 }
  0x24   : > { %p741_p5 = pnand %p740_p3, %p734_p0 }
  0x8b   : > { %v427_v6 = vpop.permute.xlu1 %426  ;;  %v267_v7 = vpop.permute.xlu0 %266 }
  0x8f   : > { %v429_v8 = vpop.permute.xlu1 %428  ;;  %v269_v9 = vpop.permute.xlu0 %268 }
  0x90   : > { %v271_v11 = vsel %vm270_vm3, %v267_v7, %v269_v9  ;;  %v431_v12 = vsel %vm430_vm4, %v427_v6, %v429_v8 }
  0x91   : > { %656 = vmatpush3.msk.msra.mxu0 %vm276_vm1, %v271_v11 }
  0x92   : > { %658 = vmatmul.mubr.msk.f32.vlgmr.msra.gmra.mxu0 %vm272_vm2, %v633_v10  ;;  %665 = vmatprep.subr.mxu0 %v809_v0 }
  0x93   : > { %666 = vmatpush3.msk.msra.mxu0 %vm276_vm1, %v431_v12  ;;  %667 = vmatprep.mubr.msk.f32.mxu0 %vm810_vm0, %v809_v0 }
  0x96   : > { %668 = vmatmul.mubr.msk.f32.vlgmr.msra.gmra.mxu0 %vm272_vm2, %v638_v13 }
  0x9c   : > { %v512_v20 = vpop.permute.xlu0 %511 }
  0xdb   : > { %v420_v14 = vpop.f32.mrf.mxu1 }
  0xdd   : > { %v664_v15 = vpop.f32.mrf.mxu1 }
 0x152   : > { %v345_v16 = vpop.f32.mrf.mxu0 }
 0x153   : > { %v421_v18 = vadd.f32 %v420_v14, %v345_v16 }
 0x154   : > { %v659_v17 = vpop.f32.mrf.mxu0 }
 0x156   : > { %v503_v19 = vpop.f32.mrf.mxu0 }
 0x157   : > { %v507_v21 = vadd.f32 %v503_v19, %v421_v18 }
 0x158   : > { %v669_v22 = vpop.f32.mrf.mxu0 }
 0x159   : > { %v514_v23 = vadd.f32 %v512_v20, %v507_v21 }
 0x15b   : > { %515 = vst [vmem:[%s240_s9] sm:$0xff] %v514_v23 }
 0x15c   : > { %744 = shalt.err (!%p741_p5)
}
 0x15d   : > { %s745_s26 = scalar_lea.hbm %s529_s13, 128  ;;  %s749_s5 = scalar_lea.hbm %s967_s4, 256 }
 0x15e   : > { %p746_p6 = scmp.ne.s32.totalorder %s529_s13, %s745_s26  ;;  %p750_p10 = scmp.lt.s32.totalorder %s529_s13, %s967_s4 }
 0x15f   : > { %p751_p11 = scmp.lt.s32.totalorder %s749_s5, %s745_s26 }
 0x160   : > { %p747_p7 = pnand %p746_p6, %p880_p4 }
 0x161   : > { %p752_p12 = por %p751_p11, %p750_p10 }
 0x162   : > { %p748_p9 = pneg %p747_p7 }
 0x164   : > { %p753_p13 = pnand %p752_p12, %p748_p9 }
 0x166   : > { %756 = shalt.err (!%p753_p13)
}
 0x167   : > { %670 = dma.vmem_to_hbm [thread:$0]  (%p880_p4), %s532_s10, 128, %s529_s13, %s517_s14  }
 0x168 PF: > { %p676_p0 = scmp.ge.s32.totalorder %s807_s20, 2  ;;  %s543_s8 = sand.u32 1, %s787_s15  }
 0x169   : > { %s544_s9 = scalar_lea.sflag [#allocation3], %s543_s8 }
 0x16a   : > { %p673_p1 = pnand %p676_p0, %p887_p8 }
 0x16c   : > { %p674_p2 = pneg %p673_p1 }
 0x16e   : > { %782 = dma.done.wait (%p674_p2), %s544_s9, 128  }
 0x16f   : > { %784 = vsyncadd (%p674_p2), %s544_s9, 4294967168  ;;  %s17_s20 = sadd.s32 1, %s807_s20   ;;  %s970_s15 = smov %s791_s16 }
 0x170   : > { %p14_p3 = scmp.ge.s32.totalorder %s17_s20, 4   ;;  %s971_s16 = smov %s795_s17 }
 0x171   : > { %s972_s17 = smov %s893_s28  ;;  %s973_s18 = smov %s803_s19 }
 0x172   : > { %s974_s19 = smov %s976_s23  ;;  %16 = sbr.rel (!%p14_p3) target bundleno = 4 (0x4), region = 76 }
 0x177   :  { %549 = vsyncpa [#allocation3], 1 }
 0x178   :  { %551 = vsyncpa [#allocation3 + $0x1], 1 }

</bundles_post_ra>
